<compile_context>
chip_gen: v6e
topology: v6e:2x2x1
jax: 0.10.0
libtpu: 0.0.40
codegen_flags: <defaults>
</compile_context>

<pallas_src>
import jax
import jax.numpy as jnp
from jax.experimental import pallas as pl
from jax.experimental.pallas import tpu as pltpu

INPUT_DIM = 30
K_PAD = 32                     # input dim zero-padded 30 -> 32 (clean sublanes)
H1, H2, H3, H4 = 256, 128, 64, 1


def mlp_kernel(xT_ref,
               w1T_ref, b1_ref,
               w2T_ref, b2_ref,
               w3T_ref, b3_ref,
               w4c_ref, b4_ref,
               o_ref):
    # Feature-major: activations are (features, TB); batch rides the lane axis.
    # TODO(synk): dropout (p=0.3) omitted — nn.Dropout is identity at inference.
    x = xT_ref[...]                                                  # (K_PAD, TB)

    h = jnp.dot(w1T_ref[...], x, preferred_element_type=jnp.float32) + b1_ref[...]
    h = jnp.maximum(h, 0.0)
    # NOTE: on v6e/v7x the three hidden matmuls could run in bf16 (f32 accum)
    # for ~2x MXU throughput; kept f32 here to preserve 1e-4 parity with torch.

    h = jnp.dot(w2T_ref[...], h, preferred_element_type=jnp.float32) + b2_ref[...]
    h = jnp.maximum(h, 0.0)

    h = jnp.dot(w3T_ref[...], h, preferred_element_type=jnp.float32) + b3_ref[...]
    h = jnp.maximum(h, 0.0)

    # Final layer has one output unit: VPU multiply + sublane reduce instead of
    # an N=1 MXU pass; result is already a lane-dense (1, TB) row.
    out = jnp.sum(h * w4c_ref[...], axis=0, keepdims=True) + b4_ref[...]
    o_ref[...] = out.astype(o_ref.dtype)


def _round_up(n, m):
    return ((n + m - 1) // m) * m


def mlp_forward(x, params, *, max_batch_tile=1024):
    """x: (B, 30) float32 -> (B, 1) float32."""
    (w1, b1), (w2, b2), (w3, b3), (w4, b4) = params
    B = x.shape[0]

    # One-time (hoisted) layout work in the wrapper: K padding + transposes.
    xT = jnp.pad(x.astype(jnp.float32),
                 ((0, 0), (0, K_PAD - INPUT_DIM))).T                 # (K_PAD, B)
    w1T = jnp.pad(w1, ((0, K_PAD - INPUT_DIM), (0, 0))).T            # (H1, K_PAD)
    w2T, w3T = w2.T, w3.T                                            # (H2,H1),(H3,H2)
    w4c = w4.reshape(H3, 1)                                          # (H3, 1)
    b1c = b1.reshape(H1, 1)
    b2c = b2.reshape(H2, 1)
    b3c = b3.reshape(H3, 1)
    b4c = b4.reshape(1, 1)

    # Lane-dense batch tile (multiple of 128), capped for v7x VMEM headroom.
    TB = min(max_batch_tile, _round_up(B, 128))
    B_pad = _round_up(B, TB)
    if B_pad != B:
        xT = jnp.pad(xT, ((0, 0), (0, B_pad - B)))
    num_tiles = B_pad // TB

    flops = 2 * B_pad * (K_PAD * H1 + H1 * H2 + H2 * H3 + H3)
    bytes_accessed = 4 * (B_pad * (K_PAD + 1)
                          + K_PAD * H1 + H1 * H2 + H2 * H3 + H3
                          + H1 + H2 + H3 + 1)

    resident = lambda i: (0, 0)   # weights/biases: same block every step (VMEM-resident)
    out = pl.pallas_call(
        mlp_kernel,
        out_shape=jax.ShapeDtypeStruct((1, B_pad), jnp.float32),
        grid=(num_tiles,),
        in_specs=[
            pl.BlockSpec((K_PAD, TB), lambda i: (0, i)),             # streamed x tile
            pl.BlockSpec((H1, K_PAD), resident),
            pl.BlockSpec((H1, 1), resident),
            pl.BlockSpec((H2, H1), resident),
            pl.BlockSpec((H2, 1), resident),
            pl.BlockSpec((H3, H2), resident),
            pl.BlockSpec((H3, 1), resident),
            pl.BlockSpec((H3, 1), resident),
            pl.BlockSpec((1, 1), resident),
        ],
        out_specs=pl.BlockSpec((1, TB), lambda i: (0, i)),           # lane-dense output
        compiler_params=pltpu.CompilerParams(
            dimension_semantics=("parallel",),                       # megacore sharding
        ),
        cost_estimate=pl.CostEstimate(
            flops=flops, transcendentals=0, bytes_accessed=bytes_accessed),
    )(xT, w1T, b1c, w2T, b2c, w3T, b3c, w4c, b4c)

    return out[0, :B].reshape(B, 1)


def init_linear(key, fan_in, fan_out):
    # Mirrors torch.nn.Linear default init: U(-1/sqrt(fan_in), 1/sqrt(fan_in)).
    kw, kb = jax.random.split(key)
    bound = 1.0 / (fan_in ** 0.5)
    w = jax.random.uniform(kw, (fan_in, fan_out), jnp.float32, -bound, bound)
    b = jax.random.uniform(kb, (fan_out,), jnp.float32, -bound, bound)
    return w, b


def init_params(key):
    k1, k2, k3, k4 = jax.random.split(key, 4)
    return (
        init_linear(k1, INPUT_DIM, H1),
        init_linear(k2, H1, H2),
        init_linear(k3, H2, H3),
        init_linear(k4, H3, H4),
    )


def reference_forward(x, params):
    h = x
    for i, (w, b) in enumerate(params):
        h = h @ w + b
        if i < 3:
            h = jnp.maximum(h, 0.0)
    return h


if __name__ == "__main__":
    key = jax.random.PRNGKey(0)
    k_params, k_x = jax.random.split(key)

    params = init_params(k_params)
    batch = 8
    x = jax.random.normal(k_x, (batch, INPUT_DIM), jnp.float32)

    out = jax.block_until_ready(mlp_forward(x, params))
    ref = reference_forward(x, params)

    assert out.shape == (batch, H4), out.shape
    assert jnp.allclose(out, ref, atol=1e-4, rtol=1e-4), "mismatch vs reference"

    print("KERNEL_OK")
</pallas_src>

<mosaic_0001>
module attributes {stable_mosaic.version = 11 : i64} {
  func.func @mlp_kernel(%arg0: i32, %arg1: memref<32x128xf32, #tpu.memory_space<vmem>>, %arg2: memref<256x32xf32, #tpu.memory_space<vmem>>, %arg3: memref<256x1xf32, #tpu.memory_space<vmem>>, %arg4: memref<128x256xf32, #tpu.memory_space<vmem>>, %arg5: memref<128x1xf32, #tpu.memory_space<vmem>>, %arg6: memref<64x128xf32, #tpu.memory_space<vmem>>, %arg7: memref<64x1xf32, #tpu.memory_space<vmem>>, %arg8: memref<64x1xf32, #tpu.memory_space<vmem>>, %arg9: memref<1x1xf32, #tpu.memory_space<vmem>>, %arg10: memref<1x128xf32, #tpu.memory_space<vmem>>) attributes {dimension_semantics = [#tpu.dimension_semantics<parallel>], iteration_bounds = array<i64: 1>, scalar_prefetch = 0 : i64, scratch_operands = 0 : i64, tpu.core_type = #tpu.core_type<tc>, window_params = [{transform_indices = @transform_0, window_bounds = array<i64: 32, 128>}, {pipeline_mode = #tpu.pipeline_mode<synchronous>, transform_indices = @transform_1, window_bounds = array<i64: 256, 32>}, {pipeline_mode = #tpu.pipeline_mode<synchronous>, transform_indices = @transform_2, window_bounds = array<i64: 256, 1>}, {pipeline_mode = #tpu.pipeline_mode<synchronous>, transform_indices = @transform_3, window_bounds = array<i64: 128, 256>}, {pipeline_mode = #tpu.pipeline_mode<synchronous>, transform_indices = @transform_4, window_bounds = array<i64: 128, 1>}, {pipeline_mode = #tpu.pipeline_mode<synchronous>, transform_indices = @transform_5, window_bounds = array<i64: 64, 128>}, {pipeline_mode = #tpu.pipeline_mode<synchronous>, transform_indices = @transform_6, window_bounds = array<i64: 64, 1>}, {pipeline_mode = #tpu.pipeline_mode<synchronous>, transform_indices = @transform_7, window_bounds = array<i64: 64, 1>}, {pipeline_mode = #tpu.pipeline_mode<synchronous>, transform_indices = @transform_8, window_bounds = array<i64: 1, 1>}, {transform_indices = @transform_9, window_bounds = array<i64: 1, 128>}]} {
    %c0 = arith.constant 0 : index
    %c0_0 = arith.constant 0 : index
    %0 = vector.load %arg1[%c0, %c0_0] : memref<32x128xf32, #tpu.memory_space<vmem>>, vector<32x128xf32>
    %c0_1 = arith.constant 0 : index
    %c0_2 = arith.constant 0 : index
    %1 = vector.load %arg2[%c0_1, %c0_2] : memref<256x32xf32, #tpu.memory_space<vmem>>, vector<256x32xf32>
    %cst = arith.constant dense<0.000000e+00> : vector<256x128xf32>
    %2 = tpu.matmul %1, %0, %cst {dimension_numbers = #tpu.dot_dimension_numbers<[1], [0], [0], [1], [0, 0, 1, 1], [], []>} : vector<256x32xf32>, vector<32x128xf32>, vector<256x128xf32> -> vector<256x128xf32>
    %c0_3 = arith.constant 0 : index
    %c0_4 = arith.constant 0 : index
    %3 = vector.load %arg3[%c0_3, %c0_4] : memref<256x1xf32, #tpu.memory_space<vmem>>, vector<256x1xf32>
    %4 = vector.broadcast %3 : vector<256x1xf32> to vector<256x128xf32>
    %5 = arith.addf %2, %4 : vector<256x128xf32>
    %cst_5 = arith.constant 0.000000e+00 : f32
    %6 = vector.broadcast %cst_5 : f32 to vector<256x128xf32>
    %7 = arith.maximumf %5, %6 : vector<256x128xf32>
    %c0_6 = arith.constant 0 : index
    %c0_7 = arith.constant 0 : index
    %8 = vector.load %arg4[%c0_6, %c0_7] : memref<128x256xf32, #tpu.memory_space<vmem>>, vector<128x256xf32>
    %cst_8 = arith.constant dense<0.000000e+00> : vector<128x128xf32>
    %9 = tpu.matmul %8, %7, %cst_8 {dimension_numbers = #tpu.dot_dimension_numbers<[1], [0], [0], [1], [0, 0, 1, 1], [], []>} : vector<128x256xf32>, vector<256x128xf32>, vector<128x128xf32> -> vector<128x128xf32>
    %c0_9 = arith.constant 0 : index
    %c0_10 = arith.constant 0 : index
    %10 = vector.load %arg5[%c0_9, %c0_10] : memref<128x1xf32, #tpu.memory_space<vmem>>, vector<128x1xf32>
    %11 = vector.broadcast %10 : vector<128x1xf32> to vector<128x128xf32>
    %12 = arith.addf %9, %11 : vector<128x128xf32>
    %cst_11 = arith.constant 0.000000e+00 : f32
    %13 = vector.broadcast %cst_11 : f32 to vector<128x128xf32>
    %14 = arith.maximumf %12, %13 : vector<128x128xf32>
    %c0_12 = arith.constant 0 : index
    %c0_13 = arith.constant 0 : index
    %15 = vector.load %arg6[%c0_12, %c0_13] : memref<64x128xf32, #tpu.memory_space<vmem>>, vector<64x128xf32>
    %cst_14 = arith.constant dense<0.000000e+00> : vector<64x128xf32>
    %16 = tpu.matmul %15, %14, %cst_14 {dimension_numbers = #tpu.dot_dimension_numbers<[1], [0], [0], [1], [0, 0, 1, 1], [], []>} : vector<64x128xf32>, vector<128x128xf32>, vector<64x128xf32> -> vector<64x128xf32>
    %c0_15 = arith.constant 0 : index
    %c0_16 = arith.constant 0 : index
    %17 = vector.load %arg7[%c0_15, %c0_16] : memref<64x1xf32, #tpu.memory_space<vmem>>, vector<64x1xf32>
    %18 = vector.broadcast %17 : vector<64x1xf32> to vector<64x128xf32>
    %19 = arith.addf %16, %18 : vector<64x128xf32>
    %cst_17 = arith.constant 0.000000e+00 : f32
    %20 = vector.broadcast %cst_17 : f32 to vector<64x128xf32>
    %21 = arith.maximumf %19, %20 : vector<64x128xf32>
    %c0_18 = arith.constant 0 : index
    %c0_19 = arith.constant 0 : index
    %22 = vector.load %arg8[%c0_18, %c0_19] : memref<64x1xf32, #tpu.memory_space<vmem>>, vector<64x1xf32>
    %23 = vector.broadcast %22 : vector<64x1xf32> to vector<64x128xf32>
    %24 = arith.mulf %21, %23 : vector<64x128xf32>
    %cst_20 = arith.constant dense<0.000000e+00> : vector<128xf32>
    %25 = vector.multi_reduction <add>, %24, %cst_20 [0] : vector<64x128xf32> to vector<128xf32>
    %26 = vector.shape_cast %25 : vector<128xf32> to vector<1x128xf32>
    %c0_21 = arith.constant 0 : index
    %c0_22 = arith.constant 0 : index
    %27 = vector.load %arg9[%c0_21, %c0_22] : memref<1x1xf32, #tpu.memory_space<vmem>>, vector<1x1xf32>
    %28 = vector.broadcast %27 : vector<1x1xf32> to vector<1x128xf32>
    %29 = arith.addf %26, %28 : vector<1x128xf32>
    %c0_23 = arith.constant 0 : index
    %c0_24 = arith.constant 0 : index
    %30 = vector.load %arg10[%c0_23, %c0_24] : memref<1x128xf32, #tpu.memory_space<vmem>>, vector<1x128xf32>
    tpu.vector_store %arg10[%c0_23, %c0_24], %29 {strides = array<i32>} : memref<1x128xf32, #tpu.memory_space<vmem>>, vector<1x128xf32>,
    return
  }
  func.func @transform_0(%arg0: i32) -> (i32, i32) {
    %c0_i32 = arith.constant 0 : i32
    %c0_i32_0 = arith.constant 0 : i32
    return %c0_i32, %arg0 : i32, i32
  }
  func.func @transform_1(%arg0: i32) -> (i32, i32) {
    %c0_i32 = arith.constant 0 : i32
    %c0_i32_0 = arith.constant 0 : i32
    %c0_i32_1 = arith.constant 0 : i32
    return %c0_i32, %c0_i32_0 : i32, i32
  }
  func.func @transform_2(%arg0: i32) -> (i32, i32) {
    %c0_i32 = arith.constant 0 : i32
    %c0_i32_0 = arith.constant 0 : i32
    %c0_i32_1 = arith.constant 0 : i32
    return %c0_i32, %c0_i32_0 : i32, i32
  }
  func.func @transform_3(%arg0: i32) -> (i32, i32) {
    %c0_i32 = arith.constant 0 : i32
    %c0_i32_0 = arith.constant 0 : i32
    %c0_i32_1 = arith.constant 0 : i32
    return %c0_i32, %c0_i32_0 : i32, i32
  }
  func.func @transform_4(%arg0: i32) -> (i32, i32) {
    %c0_i32 = arith.constant 0 : i32
    %c0_i32_0 = arith.constant 0 : i32
    %c0_i32_1 = arith.constant 0 : i32
    return %c0_i32, %c0_i32_0 : i32, i32
  }
  func.func @transform_5(%arg0: i32) -> (i32, i32) {
    %c0_i32 = arith.constant 0 : i32
    %c0_i32_0 = arith.constant 0 : i32
    %c0_i32_1 = arith.constant 0 : i32
    return %c0_i32, %c0_i32_0 : i32, i32
  }
  func.func @transform_6(%arg0: i32) -> (i32, i32) {
    %c0_i32 = arith.constant 0 : i32
    %c0_i32_0 = arith.constant 0 : i32
    %c0_i32_1 = arith.constant 0 : i32
    return %c0_i32, %c0_i32_0 : i32, i32
  }
  func.func @transform_7(%arg0: i32) -> (i32, i32) {
    %c0_i32 = arith.constant 0 : i32
    %c0_i32_0 = arith.constant 0 : i32
    %c0_i32_1 = arith.constant 0 : i32
    return %c0_i32, %c0_i32_0 : i32, i32
  }
  func.func @transform_8(%arg0: i32) -> (i32, i32) {
    %c0_i32 = arith.constant 0 : i32
    %c0_i32_0 = arith.constant 0 : i32
    %c0_i32_1 = arith.constant 0 : i32
    return %c0_i32, %c0_i32_0 : i32, i32
  }
  func.func @transform_9(%arg0: i32) -> (i32, i32) {
    %c0_i32 = arith.constant 0 : i32
    %c0_i32_0 = arith.constant 0 : i32
    return %c0_i32, %arg0 : i32, i32
  }
}

</mosaic_0001>

<bundles_post_ra>
// kernel: tpu_custom_call.1
= control target key start
LH: loop header
LB: loop body
LE: loop exit
PB: predicated region body
PF: predicated region fallthrough
CT: control target
= control target key end

     0   :  { %s2050_s0 = inlined_call_operand.vmem [shape: f32[32,128], index: 0, kind: input, shape index: {}]   ;;  %s2051_s1 = inlined_call_operand.vmem [shape: f32[256,32], index: 1, kind: input, shape index: {}]   ;;  %s2052_s2 = inlined_call_operand.vmem [shape: f32[256,1], index: 2, kind: input, shape index: {}]   ;;  %s2053_s3 = inlined_call_operand.vmem [shape: f32[128,256], index: 3, kind: input, shape index: {}]   ;;  %s2054_s4 = inlined_call_operand.vmem [shape: f32[128,1], index: 4, kind: input, shape index: {}]   ;;  %s2055_s5 = inlined_call_operand.vmem [shape: f32[64,128], index: 5, kind: input, shape index: {}]   ;;  %s2056_s6 = inlined_call_operand.vmem [shape: f32[64,1], index: 6, kind: input, shape index: {}]   ;;  %s2057_s7 = inlined_call_operand.vmem [shape: f32[64,1], index: 7, kind: input, shape index: {}]   ;;  %s2058_s8 = inlined_call_operand.<no memory space> [shape: f32[1,1], index: 8, kind: input, shape index: {}]   ;;  %s2059_s9 = inlined_call_operand.hbm [shape: f32[1,128], index: 9, kind: output, shape index: {}]  }
   0x1   :  { %v14_v0 = vstv %s2058_s8 }
   0x2   :  { %15 = vst [vmem:[#allocation2] sm:$0x1] %v14_v0 }
   0x3   :  { %v38_v1 = vld [vmem:[%s2050_s0 + $0x18] sm:$0xff]  ;;  %v101_v3 = vld [vmem:[%s2052_s2 + $0xf0] sm:$0xff]  ;;  %v1468_v4 = vmov 0   ;;  %vm263_vm0 = vcmask 261120   ;;  %v39_v6 = vld [vmem:[%s2051_s1] sm:$0xff] }
   0x4   :  { %v102_v2 = vld [vmem:[%s2052_s2 + $0xf8] sm:$0xff]  ;;  %1445 = vset.pattern.permute.xlu1 %v1468_v4  ;;  %1444 = vset.pattern.permute.xlu0 %v1468_v4  ;;  %v37_v5 = vld [vmem:[%s2050_s0 + $0x10] sm:$0xff]  ;;  %v36_v7 = vld [vmem:[%s2050_s0 + $0x8] sm:$0xff] }
   0x5   :  { %1342 = vmatprep.subr.mxu0 %v38_v1  ;;  %260 = vperm.xlu0 %1444, %v102_v2   ;;  %v86_v8 = vld [vmem:[%s2052_s2 + $0x78] sm:$0xff]  ;;  %v85_v9 = vld [vmem:[%s2052_s2 + $0x70] sm:$0xff]  ;;  %v35_v10 = vld [vmem:[%s2050_s0] sm:$0xff] }
   0x6   :  { %255 = vperm.xlu1 %1445, %v101_v3   ;;  %1343 = vmatpush3.msra.mxu0 %v38_v1  ;;  %v40_v11 = vld [vmem:[%s2051_s1 + $0x8] sm:$0xff]  ;;  %v41_v14 = vld [vmem:[%s2051_s1 + $0x10] sm:$0xff]  ;;  %v42_v15 = vld [vmem:[%s2051_s1 + $0x18] sm:$0xff] }
   0x7   :  { %1344 = vmatprep.subr.mxu0 %v37_v5  ;;  %1350 = vmatprep.mubr.msk.f32.mxu0 %vm263_vm0, %v39_v6  ;;  %v100_v12 = vld [vmem:[%s2052_s2 + $0xe8] sm:$0xff]  ;;  %v99_v16 = vld [vmem:[%s2052_s2 + $0xe0] sm:$0xff]  ;;  %v98_v20 = vld [vmem:[%s2052_s2 + $0xd8] sm:$0xff] }
   0x8   :  { %1345 = vmatpush3.msra.mxu0 %v37_v5  ;;  %v84_v13 = vld [vmem:[%s2052_s2 + $0x68] sm:$0xff]  ;;  %v83_v17 = vld [vmem:[%s2052_s2 + $0x60] sm:$0xff]  ;;  %v82_v21 = vld [vmem:[%s2052_s2 + $0x58] sm:$0xff] }
   0x9   :  { %1346 = vmatprep.subr.mxu0 %v36_v7  ;;  %180 = vperm.xlu0 %1444, %v86_v8   ;;  %v43_v18 = vld [vmem:[%s2051_s1 + $0x20] sm:$0xff]  ;;  %v44_v19 = vld [vmem:[%s2051_s1 + $0x28] sm:$0xff]  ;;  %v45_v22 = vld [vmem:[%s2051_s1 + $0x30] sm:$0xff] }
   0xa   :  { %175 = vperm.xlu1 %1445, %v85_v9   ;;  %1347 = vmatpush3.msra.mxu0 %v36_v7  ;;  %v46_v23 = vld [vmem:[%s2051_s1 + $0x38] sm:$0xff]  ;;  %v97_v24 = vld [vmem:[%s2052_s2 + $0xd0] sm:$0xff]  ;;  %v47_v26 = vld [vmem:[%s2051_s1 + $0x40] sm:$0xff] }
   0xb   :  { %1348 = vmatprep.subr.mxu0 %v35_v10  ;;  %v81_v25 = vld [vmem:[%s2052_s2 + $0x50] sm:$0xff]  ;;  %v48_v27 = vld [vmem:[%s2051_s1 + $0x48] sm:$0xff]  ;;  %v50_v31 = vld [vmem:[%s2051_s1 + $0x58] sm:$0xff] }
   0xc   :  { %1349 = vmatpush3.msra.mxu0 %v35_v10  ;;  %v96_v28 = vld [vmem:[%s2052_s2 + $0xc8] sm:$0xff]  ;;  %v49_v30 = vld [vmem:[%s2051_s1 + $0x50] sm:$0xff]  ;;  %v95_v32 = vld [vmem:[%s2052_s2 + $0xc0] sm:$0xff] }
   0xd   :  { %1351 = vmatmul.mubr.msk.f32.vlgmr.msra.gmra.mxu0 %vm263_vm0, %v40_v11  ;;  %250 = vperm.xlu0 %1444, %v100_v12   ;;  %v80_v29 = vld [vmem:[%s2052_s2 + $0x48] sm:$0xff]  ;;  %v79_v33 = vld [vmem:[%s2052_s2 + $0x40] sm:$0xff]  ;;  %v94_v36 = vld [vmem:[%s2052_s2 + $0xb8] sm:$0xff] }
   0xe   :  { %170 = vperm.xlu1 %1445, %v84_v13   ;;  %1353 = vmatprep.mubr.msk.f32.mxu0 %vm263_vm0, %v41_v14  ;;  %v51_v34 = vld [vmem:[%s2051_s1 + $0x60] sm:$0xff]  ;;  %v52_v35 = vld [vmem:[%s2051_s1 + $0x68] sm:$0xff]  ;;  %v78_v37 = vld [vmem:[%s2052_s2 + $0x38] sm:$0xff] }
   0xf   :  { %v53_v38 = vld [vmem:[%s2051_s1 + $0x70] sm:$0xff] }
  0x11   :  { %1354 = vmatmul.mubr.msk.f32.gmra.mxu0 %vm263_vm0, %v42_v15  ;;  %245 = vperm.xlu0 %1444, %v99_v16  }
  0x12   :  { %165 = vperm.xlu1 %1445, %v83_v17   ;;  %1356 = vmatprep.mubr.msk.f32.mxu0 %vm263_vm0, %v43_v18 }
  0x15   :  { %1357 = vmatmul.mubr.msk.f32.gmra.mxu0 %vm263_vm0, %v44_v19  ;;  %240 = vperm.xlu0 %1444, %v98_v20  }
  0x16   :  { %160 = vperm.xlu1 %1445, %v82_v21   ;;  %1359 = vmatprep.mubr.msk.f32.mxu0 %vm263_vm0, %v45_v22 }
  0x19   :  { %1360 = vmatmul.mubr.msk.f32.gmra.mxu0 %vm263_vm0, %v46_v23  ;;  %235 = vperm.xlu0 %1444, %v97_v24  }
  0x1a   :  { %155 = vperm.xlu1 %1445, %v81_v25   ;;  %1362 = vmatprep.mubr.msk.f32.mxu0 %vm263_vm0, %v47_v26 }
  0x1d   :  { %1363 = vmatmul.mubr.msk.f32.gmra.mxu0 %vm263_vm0, %v48_v27  ;;  %230 = vperm.xlu0 %1444, %v96_v28  }
  0x1e   :  { %150 = vperm.xlu1 %1445, %v80_v29   ;;  %1365 = vmatprep.mubr.msk.f32.mxu0 %vm263_vm0, %v49_v30 }
  0x21   :  { %1366 = vmatmul.mubr.msk.f32.gmra.mxu0 %vm263_vm0, %v50_v31  ;;  %225 = vperm.xlu0 %1444, %v95_v32  }
  0x22   :  { %145 = vperm.xlu1 %1445, %v79_v33   ;;  %1368 = vmatprep.mubr.msk.f32.mxu0 %vm263_vm0, %v51_v34 }
  0x23   :  { %16 = vsyncpa [#allocation4], 0  ;;  %v54_v39 = vld [vmem:[%s2051_s1 + $0x78] sm:$0xff]  ;;  %v93_v40 = vld [vmem:[%s2052_s2 + $0xb0] sm:$0xff] }
  0x24   :  { %v77_v41 = vld [vmem:[%s2052_s2 + $0x30] sm:$0xff]  ;;  %v55_v42 = vld [vmem:[%s2051_s1 + $0x80] sm:$0xff]  ;;  %v56_v43 = vld [vmem:[%s2051_s1 + $0x88] sm:$0xff] }
  0x25   :  { %1369 = vmatmul.mubr.msk.f32.gmra.mxu0 %vm263_vm0, %v52_v35  ;;  %220 = vperm.xlu0 %1444, %v94_v36   ;;  %v92_v44 = vld [vmem:[%s2052_s2 + $0xa8] sm:$0xff]  ;;  %v57_v46 = vld [vmem:[%s2051_s1 + $0x90] sm:$0xff]  ;;  %v58_v47 = vld [vmem:[%s2051_s1 + $0x98] sm:$0xff] }
  0x26   :  { %140 = vperm.xlu1 %1445, %v78_v37   ;;  %1371 = vmatprep.mubr.msk.f32.mxu0 %vm263_vm0, %v53_v38  ;;  %v76_v45 = vld [vmem:[%s2052_s2 + $0x28] sm:$0xff]  ;;  %v91_v48 = vld [vmem:[%s2052_s2 + $0xa0] sm:$0xff]  ;;  %v90_v52 = vld [vmem:[%s2052_s2 + $0x98] sm:$0xff] }
  0x27   :  { %v75_v49 = vld [vmem:[%s2052_s2 + $0x20] sm:$0xff]  ;;  %v60_v51 = vld [vmem:[%s2051_s1 + $0xa8] sm:$0xff]  ;;  %v74_v53 = vld [vmem:[%s2052_s2 + $0x18] sm:$0xff] }
  0x28   :  { %v59_v50 = vld [vmem:[%s2051_s1 + $0xa0] sm:$0xff]  ;;  %v61_v54 = vld [vmem:[%s2051_s1 + $0xb0] sm:$0xff]  ;;  %v62_v55 = vld [vmem:[%s2051_s1 + $0xb8] sm:$0xff] }
  0x29   :  { %1372 = vmatmul.mubr.msk.f32.gmra.mxu0 %vm263_vm0, %v54_v39  ;;  %215 = vperm.xlu0 %1444, %v93_v40   ;;  %v89_v56 = vld [vmem:[%s2052_s2 + $0x90] sm:$0xff]  ;;  %v63_v58 = vld [vmem:[%s2051_s1 + $0xc0] sm:$0xff]  ;;  %v64_v59 = vld [vmem:[%s2051_s1 + $0xc8] sm:$0xff] }
  0x2a   :  { %135 = vperm.xlu1 %1445, %v77_v41   ;;  %1374 = vmatprep.mubr.msk.f32.mxu0 %vm263_vm0, %v55_v42  ;;  %v73_v57 = vld [vmem:[%s2052_s2 + $0x10] sm:$0xff]  ;;  %v88_v60 = vld [vmem:[%s2052_s2 + $0x88] sm:$0xff]  ;;  %v66_v63 = vld [vmem:[%s2051_s1 + $0xd8] sm:$0xff] }
  0x2b   :  { %v72_v61 = vld [vmem:[%s2052_s2 + $0x8] sm:$0xff]  ;;  %v65_v62 = vld [vmem:[%s2051_s1 + $0xd0] sm:$0xff]  ;;  %v87_v0 = vld [vmem:[%s2052_s2 + $0x80] sm:$0xff] }
  0x2c   :  { %v71_v1 = vld [vmem:[%s2052_s2] sm:$0xff]  ;;  %v68_v3 = vld [vmem:[%s2051_s1 + $0xe8] sm:$0xff]  ;;  %v664_v4 = vld [vmem:[%s2054_s4 + $0x78] sm:$0xff] }
  0x2d   :  { %1375 = vmatmul.mubr.msk.f32.gmra.mxu0 %vm263_vm0, %v56_v43  ;;  %210 = vperm.xlu0 %1444, %v92_v44   ;;  %v67_v2 = vld [vmem:[%s2051_s1 + $0xe0] sm:$0xff]  ;;  %v663_v5 = vld [vmem:[%s2054_s4 + $0x70] sm:$0xff]  ;;  %v70_v7 = vld [vmem:[%s2051_s1 + $0xf8] sm:$0xff] }
  0x2e   :  { %130 = vperm.xlu1 %1445, %v76_v45   ;;  %1377 = vmatprep.mubr.msk.f32.mxu0 %vm263_vm0, %v57_v46  ;;  %v69_v6 = vld [vmem:[%s2051_s1 + $0xf0] sm:$0xff]  ;;  %v662_v8 = vld [vmem:[%s2054_s4 + $0x68] sm:$0xff]  ;;  %v661_v9 = vld [vmem:[%s2054_s4 + $0x60] sm:$0xff] }
  0x2f   :  { %v660_v10 = vld [vmem:[%s2054_s4 + $0x58] sm:$0xff]  ;;  %v659_v11 = vld [vmem:[%s2054_s4 + $0x50] sm:$0xff]  ;;  %v658_v12 = vld [vmem:[%s2054_s4 + $0x48] sm:$0xff] }
  0x30   :  { %v657_v13 = vld [vmem:[%s2054_s4 + $0x40] sm:$0xff]  ;;  %v656_v14 = vld [vmem:[%s2054_s4 + $0x38] sm:$0xff]  ;;  %v655_v15 = vld [vmem:[%s2054_s4 + $0x30] sm:$0xff] }
  0x31   :  { %1378 = vmatmul.mubr.msk.f32.gmra.mxu0 %vm263_vm0, %v58_v47  ;;  %205 = vperm.xlu0 %1444, %v91_v48   ;;  %v654_v16 = vld [vmem:[%s2054_s4 + $0x28] sm:$0xff]  ;;  %v653_v17 = vld [vmem:[%s2054_s4 + $0x20] sm:$0xff]  ;;  %v652_v18 = vld [vmem:[%s2054_s4 + $0x18] sm:$0xff] }
  0x32   :  { %125 = vperm.xlu1 %1445, %v75_v49   ;;  %1380 = vmatprep.mubr.msk.f32.mxu0 %vm263_vm0, %v59_v50  ;;  %v651_v19 = vld [vmem:[%s2054_s4 + $0x10] sm:$0xff]  ;;  %v650_v20 = vld [vmem:[%s2054_s4 + $0x8] sm:$0xff]  ;;  %v649_v21 = vld [vmem:[%s2054_s4] sm:$0xff] }
  0x33   :  { %v914_v22 = vld [vmem:[%s2056_s6] sm:$0xff]  ;;  %v915_v23 = vld [vmem:[%s2056_s6 + $0x8] sm:$0xff]  ;;  %v916_v24 = vld [vmem:[%s2056_s6 + $0x10] sm:$0xff] }
  0x34   :  { %v917_v25 = vld [vmem:[%s2056_s6 + $0x18] sm:$0xff]  ;;  %v1075_v26 = vld [vmem:[%s2057_s7] sm:$0xff]  ;;  %v1076_v27 = vld [vmem:[%s2057_s7 + $0x8] sm:$0xff] }
  0x35   :  { %1381 = vmatmul.mubr.msk.f32.gmra.mxu0 %vm263_vm0, %v60_v51  ;;  %200 = vperm.xlu0 %1444, %v90_v52   ;;  %v918_v28 = vld [vmem:[%s2056_s6 + $0x20] sm:$0xff]  ;;  %v1077_v29 = vld [vmem:[%s2057_s7 + $0x10] sm:$0xff]  ;;  %v919_v30 = vld [vmem:[%s2056_s6 + $0x28] sm:$0xff] }
  0x36   :  { %120 = vperm.xlu1 %1445, %v74_v53   ;;  %1383 = vmatprep.mubr.msk.f32.mxu0 %vm263_vm0, %v61_v54  ;;  %v1078_v31 = vld [vmem:[%s2057_s7 + $0x18] sm:$0xff]  ;;  %v920_v32 = vld [vmem:[%s2056_s6 + $0x30] sm:$0xff]  ;;  %v1079_v33 = vld [vmem:[%s2057_s7 + $0x20] sm:$0xff] }
  0x37   :  { %v921_v34 = vld [vmem:[%s2056_s6 + $0x38] sm:$0xff]  ;;  %v1080_v35 = vld [vmem:[%s2057_s7 + $0x28] sm:$0xff]  ;;  %v1081_v36 = vld [vmem:[%s2057_s7 + $0x30] sm:$0xff] }
  0x38   :  { %v1082_v37 = vld [vmem:[%s2057_s7 + $0x38] sm:$0xff]  ;;  %v1144_v38 = vld [vmem:[#allocation2] sm:$0x1]  ;;  %v618_v39 = vld [vmem:[%s2053_s3 + $0x8] sm:$0xff] }
  0x39   :  { %1384 = vmatmul.mubr.msk.f32.gmra.mxu0 %vm263_vm0, %v62_v55  ;;  %195 = vperm.xlu0 %1444, %v89_v56  }
  0x3a   :  { %115 = vperm.xlu1 %1445, %v73_v57   ;;  %1386 = vmatprep.mubr.msk.f32.mxu0 %vm263_vm0, %v63_v58 }
  0x3b   :  { %809 = vmatprep.mubr.f32.mxu1 %v618_v39 }
  0x3d   :  { %1387 = vmatmul.mubr.msk.f32.gmra.mxu0 %vm263_vm0, %v64_v59  ;;  %190 = vperm.xlu0 %1444, %v88_v60  }
  0x3e   :  { %110 = vperm.xlu1 %1445, %v72_v61   ;;  %1389 = vmatprep.mubr.msk.f32.mxu0 %vm263_vm0, %v65_v62 }
  0x41   :  { %1390 = vmatmul.mubr.msk.f32.gmra.mxu0 %vm263_vm0, %v66_v63  ;;  %185 = vperm.xlu0 %1444, %v87_v0  }
  0x42   :  { %105 = vperm.xlu1 %1445, %v71_v1   ;;  %1392 = vmatprep.mubr.msk.f32.mxu0 %vm263_vm0, %v67_v2 }
  0x45   :  { %1393 = vmatmul.mubr.msk.f32.gmra.mxu0 %vm263_vm0, %v68_v3  ;;  %742 = vperm.xlu0 %1444, %v664_v4  }
  0x46   :  { %737 = vperm.xlu1 %1445, %v663_v5   ;;  %1395 = vmatprep.mubr.msk.f32.mxu0 %vm263_vm0, %v69_v6 }
  0x49   :  { %1396 = vmatmul.mubr.msk.f32.gmra.mxu0 %vm263_vm0, %v70_v7  ;;  %732 = vperm.xlu0 %1444, %v662_v8  }
  0x4a   :  { %727 = vperm.xlu1 %1445, %v661_v9  }
  0x4d   :  { %722 = vperm.xlu0 %1444, %v660_v10  }
  0x4e   :  { %717 = vperm.xlu1 %1445, %v659_v11  }
  0x51   :  { %712 = vperm.xlu0 %1444, %v658_v12  }
  0x52   :  { %707 = vperm.xlu1 %1445, %v657_v13  }
  0x55   :  { %702 = vperm.xlu0 %1444, %v656_v14  }
  0x56   :  { %697 = vperm.xlu1 %1445, %v655_v15  }
  0x59   :  { %692 = vperm.xlu0 %1444, %v654_v16  }
  0x5a   :  { %687 = vperm.xlu1 %1445, %v653_v17  }
  0x5d   :  { %682 = vperm.xlu0 %1444, %v652_v18  }
  0x5e   :  { %677 = vperm.xlu1 %1445, %v651_v19  }
  0x61   :  { %672 = vperm.xlu0 %1444, %v650_v20  }
  0x62   :  { %667 = vperm.xlu1 %1445, %v649_v21  }
  0x65   :  { %924 = vperm.xlu0 %1444, %v914_v22  }
  0x66   :  { %929 = vperm.xlu1 %1445, %v915_v23  }
  0x69   :  { %934 = vperm.xlu0 %1444, %v916_v24  }
  0x6a   :  { %939 = vperm.xlu1 %1445, %v917_v25  }
  0x6d   :  { %1085 = vperm.xlu0 %1444, %v1075_v26  }
  0x6e   :  { %1090 = vperm.xlu1 %1445, %v1076_v27  }
  0x71   :  { %944 = vperm.xlu0 %1444, %v918_v28  }
  0x72   :  { %1095 = vperm.xlu1 %1445, %v1077_v29  }
  0x75   :  { %949 = vperm.xlu0 %1444, %v919_v30  }
  0x76   :  { %1100 = vperm.xlu1 %1445, %v1078_v31  }
  0x79   :  { %954 = vperm.xlu0 %1444, %v920_v32  }
  0x7a   :  { %1105 = vperm.xlu1 %1445, %v1079_v33  }
  0x7d   :  { %959 = vperm.xlu0 %1444, %v921_v34  }
  0x7e   :  { %1110 = vperm.xlu1 %1445, %v1080_v35  }
  0x80   :  { %v261_v40 = vpop.permute.xlu0 %260 }
  0x81   :  { %1115 = vperm.xlu0 %1444, %v1081_v36   ;;  %v256_v41 = vpop.permute.xlu1 %255 }
  0x82   :  { %1120 = vperm.xlu1 %1445, %v1082_v37  }
  0x84   :  { %v181_v44 = vpop.permute.xlu0 %180 }
  0x85   :  { %1147 = vperm.xlu0 %1444, %v1144_v38   ;;  %v176_v46 = vpop.permute.xlu1 %175 }
  0x88   :  { %v251_v49 = vpop.permute.xlu0 %250 }
  0x89   :  { %v171_v51 = vpop.permute.xlu1 %170 }
  0x8c   :  { %v246_v54 = vpop.permute.xlu0 %245 }
  0x8d   :  { %v166_v56 = vpop.permute.xlu1 %165 }
  0x90   :  { %v241_v59 = vpop.permute.xlu0 %240 }
  0x91   :  { %v161_v61 = vpop.permute.xlu1 %160 }
  0x94   :  { %v236_v0 = vpop.permute.xlu0 %235 }
  0x95   :  { %v156_v2 = vpop.permute.xlu1 %155 }
  0x98   :  { %v231_v5 = vpop.permute.xlu0 %230 }
  0x99   :  { %v151_v7 = vpop.permute.xlu1 %150 }
  0x9c   :  { %v226_v10 = vpop.permute.xlu0 %225 }
  0x9d   :  { %v146_v12 = vpop.permute.xlu1 %145 }
  0xa0   :  { %v221_v15 = vpop.permute.xlu0 %220 }
  0xa1   :  { %v141_v17 = vpop.permute.xlu1 %140 }
  0xa4   :  { %v216_v20 = vpop.permute.xlu0 %215 }
  0xa5   :  { %v136_v22 = vpop.permute.xlu1 %135 }
  0xa8   :  { %v211_v25 = vpop.permute.xlu0 %210 }
  0xa9   :  { %v131_v27 = vpop.permute.xlu1 %130 }
  0xac   :  { %v206_v36 = vpop.permute.xlu0 %205 }
  0xad   :  { %v126_v39 = vpop.permute.xlu1 %125 }
  0xcd   :  { %v1858_v42 = vpop.f32.mrf.mxu0 }
  0xce   :  { %2060 = vst [vmem:[#allocation6_spill] sm:$0xff] %v1858_v42 }
  0xcf   :  { %v1860_v43 = vpop.f32.mrf.mxu0 }
  0xd0   :  { %2061 = vst [vmem:[#allocation7_spill] sm:$0xff] %v1860_v43 }
  0xd1   :  { %v1862_v45 = vpop.f32.mrf.mxu0 }
  0xd3   :  { %v1864_v47 = vpop.f32.mrf.mxu0 }
  0xd4   :  { %2062 = vst [vmem:[#allocation8_spill] sm:$0xff] %v1864_v47 }
  0xd5   :  { %v1866_v48 = vpop.f32.mrf.mxu0 }
  0xd7   :  { %v1868_v50 = vpop.f32.mrf.mxu0 }
  0xd9   :  { %v1870_v52 = vpop.f32.mrf.mxu0 }
  0xdb   :  { %v1872_v53 = vpop.f32.mrf.mxu0 }
  0xdd   :  { %v1874_v55 = vpop.f32.mrf.mxu0 }
  0xdf   :  { %v1876_v57 = vpop.f32.mrf.mxu0 }
  0xe1   :  { %v1367_v58 = vpop.f32.mrf.mxu0 }
  0xe3   :  { %v476_v60 = vpop.f32.mrf.mxu0 }
  0xe5   :  { %v1370_v62 = vpop.f32.mrf.mxu0 }
  0xe6   :  { %v492_v37 = vadd.f32 %v1370_v62, %v171_v51  ;;  %v121_v62 = vpop.permute.xlu1 %120 }
  0xe7   :  { %v486_v63 = vpop.f32.mrf.mxu0 }
  0xe8   :  { %v487_v42 = vadd.f32 %v486_v63, %v166_v56  ;;  %v472_v56 = vadd.f32 %v1874_v55, %v151_v7 }
  0xe9   :  { %v1373_v1 = vpop.f32.mrf.mxu0 }
  0xea   :  { %v502_v28 = vadd.f32 %v1373_v1, %v181_v44  ;;  %v482_v44 = vadd.f32 %v1367_v58, %v161_v61  ;;  %v477_v1 = vadd.f32 %v476_v60, %v156_v2  ;;  %v597_v51 = vmax.f32 %v487_v42, 0.0 }
  0xeb   :  { %v496_v3 = vpop.f32.mrf.mxu0  ;;  %v467_v58 = vadd.f32 %v1876_v57, %v146_v12  ;;  %v462_v60 = vadd.f32 %v1870_v52, %v141_v17  ;;  %v594_v2 = vmax.f32 %v472_v56, 0.0  ;;  %v627_v56 = vld [vmem:[%s2053_s3 + $0x50] sm:$0xff] }
  0xec   :  { %v497_v31 = vadd.f32 %v496_v3, %v176_v46  ;;  %v600_v38 = vmax.f32 %v502_v28, 0.0  ;;  %v596_v63 = vmax.f32 %v482_v44, 0.0  ;;  %v595_v61 = vmax.f32 %v477_v1, 0.0  ;;  %v617_v44 = vld [vmem:[%s2053_s3] sm:$0xff]  ;;  %v624_v1 = vld [vmem:[%s2053_s3 + $0x38] sm:$0xff] }
  0xed   :  { %v1878_v4 = vpop.f32.mrf.mxu0  ;;  %v593_v7 = vmax.f32 %v467_v58, 0.0  ;;  %v592_v12 = vmax.f32 %v462_v60, 0.0  ;;  %v631_v58 = vld [vmem:[%s2053_s3 + $0x70] sm:$0xff]  ;;  %v638_v60 = vld [vmem:[%s2053_s3 + $0xa8] sm:$0xff] }
  0xee   :  { %2063 = vst [vmem:[#allocation9_spill] sm:$0xff] %v1878_v4  ;;  %v599_v4 = vmax.f32 %v497_v31, 0.0 }
  0xef   :  { %v1880_v6 = vpop.f32.mrf.mxu0 }
  0xf0   :  { %2064 = vst [vmem:[#allocation10_spill] sm:$0xff] %v1880_v6 }
  0xf1   :  { %v1882_v8 = vpop.f32.mrf.mxu0 }
  0xf3   :  { %v1884_v9 = vpop.f32.mrf.mxu0 }
  0xf4   :  { %2065 = vst [vmem:[#allocation11_spill] sm:$0xff] %v1884_v9 }
  0xf5   :  { %v1886_v11 = vpop.f32.mrf.mxu0 }
  0xf6   :  { %v532_v57 = vadd.f32 %v1886_v11, %v211_v25  ;;  %v442_v11 = vadd.f32 %v1862_v45, %v121_v62  ;;  %v626_v62 = vld [vmem:[%s2053_s3 + $0x48] sm:$0xff] }
  0xf7   :  { %v1888_v13 = vpop.f32.mrf.mxu0 }
  0xf8   :  { %v527_v52 = vadd.f32 %v1888_v13, %v206_v36  ;;  %v2067_v13 = vld [vmem:[#allocation8_spill] sm:$0xff] }
  0xf9   :  { %v1385_v14 = vpop.f32.mrf.mxu0 }
  0xfb   :  { %v1890_v16 = vpop.f32.mrf.mxu0 }
  0xfc   :  { %v537_v55 = vadd.f32 %v1890_v16, %v216_v20  ;;  %v447_v16 = vadd.f32 %v1868_v50, %v126_v39  ;;  %v2068_v50 = vld [vmem:[#allocation9_spill] sm:$0xff] }
  0xfd   :  { %v1388_v18 = vpop.f32.mrf.mxu0 }
  0xff   :  { %v546_v19 = vpop.f32.mrf.mxu0 }
 0x101   :  { %v1391_v21 = vpop.f32.mrf.mxu0 }
 0x102   :  { %v562_v47 = vadd.f32 %v1391_v21, %v241_v59  ;;  %v547_v59 = vadd.f32 %v546_v19, %v226_v10  ;;  %v452_v10 = vadd.f32 %v1866_v48, %v131_v27  ;;  %v606_v19 = vmax.f32 %v532_v57, 0.0  ;;  %v2066_v48 = vld [vmem:[#allocation11_spill] sm:$0xff] }
 0x103   :  { %v556_v23 = vpop.f32.mrf.mxu0  ;;  %v643_v57 = vld [vmem:[%s2053_s3 + $0xd0] sm:$0xff] }
 0x104   :  { %v557_v46 = vadd.f32 %v556_v23, %v236_v0  ;;  %v612_v3 = vmax.f32 %v562_v47, 0.0  ;;  %v116_v47 = vpop.permute.xlu1 %115  ;;  %v590_v20 = vmax.f32 %v452_v10, 0.0  ;;  %v645_v10 = vld [vmem:[%s2053_s3 + $0xe0] sm:$0xff] }
 0x105   :  { %v1394_v24 = vpop.f32.mrf.mxu0  ;;  %v437_v23 = vadd.f32 %v2067_v13, %v116_v47  ;;  %v640_v47 = vld [vmem:[%s2053_s3 + $0xb8] sm:$0xff] }
 0x106   :  { %v572_v33 = vadd.f32 %v1394_v24, %v251_v49  ;;  %v589_v24 = vmax.f32 %v447_v16, 0.0 }
 0x107   :  { %v566_v26 = vpop.f32.mrf.mxu0 }
 0x108   :  { %v567_v43 = vadd.f32 %v566_v26, %v246_v54  ;;  %v614_v9 = vmax.f32 %v572_v33, 0.0  ;;  %v552_v54 = vadd.f32 %v1388_v18, %v231_v5  ;;  %v457_v5 = vadd.f32 %v1872_v53, %v136_v22  ;;  %v111_v53 = vpop.permute.xlu1 %110  ;;  %v2071_v33 = vld [vmem:[#allocation7_spill] sm:$0xff] }
 0x109   :  { %v1397_v29 = vpop.f32.mrf.mxu0  ;;  %v605_v22 = vmax.f32 %v527_v52, 0.0  ;;  %v647_v52 = vld [vmem:[%s2053_s3 + $0xf0] sm:$0xff] }
 0x10a   :  { %v582_v30 = vadd.f32 %v1397_v29, %v261_v40  ;;  %v598_v40 = vmax.f32 %v492_v37, 0.0  ;;  %v613_v49 = vmax.f32 %v567_v43, 0.0  ;;  %v542_v43 = vadd.f32 %v1385_v14, %v221_v15 }
 0x10b   :  { %v576_v32 = vpop.f32.mrf.mxu0  ;;  %v610_v0 = vmax.f32 %v552_v54, 0.0  ;;  %v607_v14 = vmax.f32 %v537_v55, 0.0  ;;  %v591_v17 = vmax.f32 %v457_v5, 0.0  ;;  %v588_v29 = vmax.f32 %v442_v11, 0.0  ;;  %v625_v54 = vld [vmem:[%s2053_s3 + $0x40] sm:$0xff]  ;;  %v639_v55 = vld [vmem:[%s2053_s3 + $0xb0] sm:$0xff] }
 0x10c   :  { %v577_v34 = vadd.f32 %v576_v32, %v256_v41  ;;  %v616_v35 = vmax.f32 %v582_v30, 0.0  ;;  %v201_v41 = vpop.permute.xlu0 %200  ;;  %v106_v45 = vpop.permute.xlu1 %105  ;;  %v2070_v30 = vld [vmem:[#allocation10_spill] sm:$0xff] }
 0x10d   :  { %v522_v18 = vadd.f32 %v1882_v8, %v201_v41  ;;  %v2069_v8 = vld [vmem:[#allocation6_spill] sm:$0xff] }
 0x10e   :  { %v615_v6 = vmax.f32 %v577_v34, 0.0  ;;  %1238 = vmatprep.subr.mxu1 %v616_v35  ;;  %v432_v28 = vadd.f32 %v2069_v8, %v111_v53  ;;  %v427_v34 = vadd.f32 %v2071_v33, %v106_v45  ;;  %v587_v35 = vmax.f32 %v437_v23, 0.0  ;;  %v621_v41 = vld [vmem:[%s2053_s3 + $0x20] sm:$0xff] }
 0x10f   :  { %1239 = vmatpush3.msra.mxu1 %v600_v38  ;;  %v604_v26 = vmax.f32 %v522_v18, 0.0  ;;  %v641_v5 = vld [vmem:[%s2053_s3 + $0xc0] sm:$0xff] }
 0x110   :  { %1240 = vmatprep.subr.mxu1 %v615_v6  ;;  %v611_v6 = vmax.f32 %v557_v46, 0.0  ;;  %v196_v42 = vpop.permute.xlu0 %195  ;;  %v586_v37 = vmax.f32 %v432_v28, 0.0  ;;  %v585_v39 = vmax.f32 %v427_v34, 0.0  ;;  %v619_v46 = vld [vmem:[%s2053_s3 + $0x10] sm:$0xff] }
 0x111   :  { %1241 = vmatpush3.msra.mxu1 %v599_v4  ;;  %v609_v4 = vmax.f32 %v547_v59, 0.0  ;;  %v517_v21 = vadd.f32 %v2066_v48, %v196_v42  ;;  %v629_v59 = vld [vmem:[%s2053_s3 + $0x60] sm:$0xff]  ;;  %v635_v42 = vld [vmem:[%s2053_s3 + $0x90] sm:$0xff] }
 0x112   :  { %1242 = vmatprep.subr.mxu1 %v614_v9  ;;  %v608_v9 = vmax.f32 %v542_v43, 0.0  ;;  %v633_v43 = vld [vmem:[%s2053_s3 + $0x80] sm:$0xff] }
 0x113   :  { %1243 = vmatpush3.msra.mxu1 %v598_v40  ;;  %v603_v32 = vmax.f32 %v517_v21, 0.0  ;;  %v620_v40 = vld [vmem:[%s2053_s3 + $0x18] sm:$0xff] }
 0x114   :  { %1244 = vmatprep.subr.mxu1 %v613_v49  ;;  %v191_v15 = vpop.permute.xlu0 %190  ;;  %v622_v49 = vld [vmem:[%s2053_s3 + $0x28] sm:$0xff] }
 0x115   :  { %1245 = vmatpush3.msra.mxu1 %v597_v51  ;;  %v512_v25 = vadd.f32 %v2068_v50, %v191_v15  ;;  %v623_v51 = vld [vmem:[%s2053_s3 + $0x30] sm:$0xff] }
 0x116   :  { %1246 = vmatprep.subr.mxu1 %v612_v3  ;;  %v628_v3 = vld [vmem:[%s2053_s3 + $0x58] sm:$0xff] }
 0x117   :  { %1247 = vmatpush3.msra.mxu1 %v596_v63  ;;  %v602_v36 = vmax.f32 %v512_v25, 0.0  ;;  %v630_v63 = vld [vmem:[%s2053_s3 + $0x68] sm:$0xff] }
 0x118   :  { %1248 = vmatprep.subr.mxu1 %v611_v6  ;;  %v186_v27 = vpop.permute.xlu0 %185  ;;  %v632_v6 = vld [vmem:[%s2053_s3 + $0x78] sm:$0xff] }
 0x119   :  { %1249 = vmatpush3.msra.mxu1 %v595_v61  ;;  %v507_v31 = vadd.f32 %v2070_v30, %v186_v27  ;;  %v634_v61 = vld [vmem:[%s2053_s3 + $0x88] sm:$0xff] }
 0x11a   :  { %1250 = vmatprep.subr.mxu1 %v610_v0  ;;  %v636_v0 = vld [vmem:[%s2053_s3 + $0x98] sm:$0xff] }
 0x11b   :  { %1251 = vmatpush3.msra.mxu1 %v594_v2  ;;  %v601_v38 = vmax.f32 %v507_v31, 0.0  ;;  %v637_v2 = vld [vmem:[%s2053_s3 + $0xa0] sm:$0xff] }
 0x11c   :  { %1252 = vmatprep.subr.mxu1 %v609_v4  ;;  %v642_v4 = vld [vmem:[%s2053_s3 + $0xc8] sm:$0xff] }
 0x11d   :  { %1253 = vmatpush3.msra.mxu1 %v593_v7  ;;  %v644_v7 = vld [vmem:[%s2053_s3 + $0xd8] sm:$0xff] }
 0x11e   :  { %1254 = vmatprep.subr.mxu1 %v608_v9  ;;  %v646_v9 = vld [vmem:[%s2053_s3 + $0xe8] sm:$0xff] }
 0x11f   :  { %1255 = vmatpush3.msra.mxu1 %v592_v12  ;;  %v648_v12 = vld [vmem:[%s2053_s3 + $0xf8] sm:$0xff] }
 0x120   :  { %1256 = vmatprep.subr.mxu1 %v607_v14  ;;  %v906_v14 = vld [vmem:[%s2055_s5] sm:$0xff] }
 0x121   :  { %1257 = vmatpush3.msra.mxu1 %v591_v17  ;;  %1430 = vmatprep.mubr.f32.mxu0 %v906_v14 }
 0x122   :  { %1258 = vmatprep.subr.mxu1 %v606_v19 }
 0x123   :  { %1259 = vmatpush3.msra.mxu1 %v590_v20 }
 0x124   :  { %1260 = vmatprep.subr.mxu1 %v605_v22 }
 0x125   :  { %1261 = vmatpush3.msra.mxu1 %v589_v24 }
 0x126   :  { %1262 = vmatprep.subr.mxu1 %v604_v26 }
 0x127   :  { %1263 = vmatpush3.msra.mxu1 %v588_v29 }
 0x128   :  { %1264 = vmatprep.subr.mxu1 %v603_v32 }
 0x129   :  { %1265 = vmatpush3.msra.mxu1 %v587_v35 }
 0x12a   :  { %1266 = vmatprep.subr.mxu1 %v602_v36 }
 0x12b   :  { %1267 = vmatpush3.msra.mxu1 %v586_v37  ;;  %v743_v37 = vpop.permute.xlu0 %742 }
 0x12c   :  { %1268 = vmatprep.subr.mxu1 %v601_v38 }
 0x12d   :  { %1269 = vmatpush3.msra.mxu1 %v585_v39  ;;  %v738_v39 = vpop.permute.xlu1 %737 }
 0x12e   :  { %810 = vmatmul.mubr.f32.vlgmr.msra.gmra.mxu1 %v617_v44 }
 0x12f   :  { %814 = vmatprep.mubr.f32.mxu1 %v620_v40 }
 0x132   :  { %815 = vmatmul.mubr.f32.gmra.mxu1 %v619_v46  ;;  %v733_v46 = vpop.permute.xlu0 %732 }
 0x133   :  { %819 = vmatprep.mubr.f32.mxu1 %v622_v49 }
 0x136   :  { %820 = vmatmul.mubr.f32.gmra.mxu1 %v621_v41  ;;  %v728_v41 = vpop.permute.xlu1 %727 }
 0x137   :  { %824 = vmatprep.mubr.f32.mxu1 %v624_v1 }
 0x13a   :  { %825 = vmatmul.mubr.f32.gmra.mxu1 %v623_v51 }
 0x13b   :  { %829 = vmatprep.mubr.f32.mxu1 %v626_v62  ;;  %v723_v62 = vpop.permute.xlu0 %722 }
 0x13e   :  { %830 = vmatmul.mubr.f32.gmra.mxu1 %v625_v54 }
 0x13f   :  { %834 = vmatprep.mubr.f32.mxu1 %v628_v3 }
 0x142   :  { %835 = vmatmul.mubr.f32.gmra.mxu1 %v627_v56  ;;  %v718_v56 = vpop.permute.xlu1 %717 }
 0x143   :  { %839 = vmatprep.mubr.f32.mxu1 %v630_v63 }
 0x146   :  { %840 = vmatmul.mubr.f32.gmra.mxu1 %v629_v59 }
 0x147   :  { %844 = vmatprep.mubr.f32.mxu1 %v632_v6 }
 0x14a   :  { %845 = vmatmul.mubr.f32.gmra.mxu1 %v631_v58 }
 0x14b   :  { %849 = vmatprep.mubr.f32.mxu1 %v634_v61 }
 0x14e   :  { %850 = vmatmul.mubr.f32.gmra.mxu1 %v633_v43 }
 0x14f   :  { %854 = vmatprep.mubr.f32.mxu1 %v636_v0  ;;  %v713_v0 = vpop.permute.xlu0 %712 }
 0x152   :  { %855 = vmatmul.mubr.f32.gmra.mxu1 %v635_v42 }
 0x153   :  { %859 = vmatprep.mubr.f32.mxu1 %v638_v60 }
 0x156   :  { %860 = vmatmul.mubr.f32.gmra.mxu1 %v637_v2 }
 0x157   :  { %864 = vmatprep.mubr.f32.mxu1 %v640_v47  ;;  %v708_v47 = vpop.permute.xlu1 %707 }
 0x15a   :  { %865 = vmatmul.mubr.f32.gmra.mxu1 %v639_v55 }
 0x15b   :  { %869 = vmatprep.mubr.f32.mxu1 %v642_v4 }
 0x15e   :  { %870 = vmatmul.mubr.f32.gmra.mxu1 %v641_v5 }
 0x15f   :  { %874 = vmatprep.mubr.f32.mxu1 %v644_v7 }
 0x162   :  { %875 = vmatmul.mubr.f32.gmra.mxu1 %v643_v57 }
 0x163   :  { %879 = vmatprep.mubr.f32.mxu1 %v646_v9 }
 0x166   :  { %880 = vmatmul.mubr.f32.gmra.mxu1 %v645_v10  ;;  %v703_v10 = vpop.permute.xlu0 %702 }
 0x167   :  { %884 = vmatprep.mubr.f32.mxu1 %v648_v12 }
 0x16a   :  { %885 = vmatmul.mubr.f32.gmra.mxu1 %v647_v52 }
 0x1ee   :  { %v1270_v15 = vpop.f32.mrf.mxu1 }
 0x1f0   :  { %v1271_v16 = vpop.f32.mrf.mxu1 }
 0x1f1   :  { %v2005_v17 = vadd.f32 %v1271_v16, %v1270_v15  ;;  %v698_v15 = vpop.permute.xlu1 %697 }
 0x1f2   :  { %v1273_v53 = vpop.f32.mrf.mxu1 }
 0x1f4   :  { %v1274_v18 = vpop.f32.mrf.mxu1 }
 0x1f5   :  { %v2007_v19 = vadd.f32 %v1274_v18, %v1273_v53 }
 0x1f6   :  { %v1276_v11 = vpop.f32.mrf.mxu1 }
 0x1f8   :  { %v1277_v20 = vpop.f32.mrf.mxu1 }
 0x1f9   :  { %v2009_v48 = vadd.f32 %v1277_v20, %v1276_v11 }
 0x1fa   :  { %v1279_v21 = vpop.f32.mrf.mxu1 }
 0x1fc   :  { %v1280_v22 = vpop.f32.mrf.mxu1 }
 0x1fd   :  { %v2011_v13 = vadd.f32 %v1280_v22, %v1279_v21  ;;  %v693_v22 = vpop.permute.xlu0 %692 }
 0x1fe   :  { %v1282_v23 = vpop.f32.mrf.mxu1 }
 0x200   :  { %v1283_v24 = vpop.f32.mrf.mxu1 }
 0x201   :  { %v2013_v50 = vadd.f32 %v1283_v24, %v1282_v23 }
 0x202   :  { %v2015_v25 = vpop.f32.mrf.mxu1 }
 0x204   :  { %v2017_v26 = vpop.f32.mrf.mxu1 }
 0x205   :  { %v1287_v23 = vadd.f32 %v2017_v26, %v2015_v25 }
 0x206   :  { %v1288_v27 = vpop.f32.mrf.mxu1 }
 0x208   :  { %v1289_v8 = vpop.f32.mrf.mxu1 }
 0x209   :  { %v1290_v11 = vadd.f32 %v1289_v8, %v1288_v27  ;;  %v683_v27 = vpop.permute.xlu0 %682 }
 0x20a   :  { %v1291_v28 = vpop.f32.mrf.mxu1  ;;  %v827_v25 = vadd.f32 %v2011_v13, %v683_v27 }
 0x20c   :  { %v1292_v29 = vpop.f32.mrf.mxu1 }
 0x20d   :  { %v1293_v16 = vadd.f32 %v1292_v29, %v1291_v28  ;;  %v837_v29 = vadd.f32 %v1287_v23, %v693_v22 }
 0x20e   :  { %v1294_v45 = vpop.f32.mrf.mxu1 }
 0x20f   :  { %v847_v24 = vadd.f32 %v1293_v16, %v703_v10  ;;  %v895_v26 = vmax.f32 %v837_v29, 0.0 }
 0x210   :  { %v1295_v30 = vpop.f32.mrf.mxu1 }
 0x211   :  { %v1296_v12 = vadd.f32 %v1295_v30, %v1294_v45  ;;  %v688_v30 = vpop.permute.xlu1 %687 }
 0x212   :  { %v1297_v31 = vpop.f32.mrf.mxu1  ;;  %v832_v8 = vadd.f32 %v2013_v50, %v688_v30 }
 0x213   :  { %v852_v20 = vadd.f32 %v1296_v12, %v708_v47 }
 0x214   :  { %v1298_v32 = vpop.f32.mrf.mxu1 }
 0x215   :  { %v1299_v7 = vadd.f32 %v1298_v32, %v1297_v31  ;;  %v842_v31 = vadd.f32 %v1290_v11, %v698_v15  ;;  %v898_v28 = vmax.f32 %v852_v20, 0.0  ;;  %v897_v32 = vmax.f32 %v847_v24, 0.0 }
 0x216   :  { %v1300_v33 = vpop.f32.mrf.mxu1 }
 0x217   :  { %v857_v53 = vadd.f32 %v1299_v7, %v713_v0 }
 0x218   :  { %v1301_v34 = vpop.f32.mrf.mxu1 }
 0x219   :  { %v1302_v55 = vadd.f32 %v1301_v34, %v1300_v33  ;;  %v899_v45 = vmax.f32 %v857_v53, 0.0  ;;  %v896_v33 = vmax.f32 %v842_v31, 0.0  ;;  %v678_v34 = vpop.permute.xlu1 %677 }
 0x21a   :  { %v1303_v35 = vpop.f32.mrf.mxu1 }
 0x21b   :  { %v862_v52 = vadd.f32 %v1302_v55, %v718_v56 }
 0x21c   :  { %v1304_v36 = vpop.f32.mrf.mxu1 }
 0x21d   :  { %v1305_v42 = vadd.f32 %v1304_v36, %v1303_v35  ;;  %v900_v21 = vmax.f32 %v862_v52, 0.0  ;;  %v822_v35 = vadd.f32 %v2009_v48, %v678_v34  ;;  %v894_v36 = vmax.f32 %v832_v8, 0.0  ;;  %v668_v50 = vpop.permute.xlu1 %667  ;;  %v907_v48 = vld [vmem:[%s2055_s5 + $0x8] sm:$0xff] }
 0x21e   :  { %v1306_v38 = vpop.f32.mrf.mxu1 }
 0x21f   :  { %v867_v57 = vadd.f32 %v1305_v42, %v723_v62 }
 0x220   :  { %v1307_v44 = vpop.f32.mrf.mxu1 }
 0x221   :  { %v1308_v58 = vadd.f32 %v1307_v44, %v1306_v38  ;;  %v901_v18 = vmax.f32 %v867_v57, 0.0  ;;  %v812_v44 = vadd.f32 %v2005_v17, %v668_v50  ;;  %v909_v17 = vld [vmem:[%s2055_s5 + $0x18] sm:$0xff] }
 0x222   :  { %v1309_v40 = vpop.f32.mrf.mxu1 }
 0x223   :  { %v872_v4 = vadd.f32 %v1308_v58, %v728_v41  ;;  %v911_v41 = vld [vmem:[%s2055_s5 + $0x28] sm:$0xff] }
 0x224   :  { %v1310_v49 = vpop.f32.mrf.mxu1 }
 0x225   :  { %v1311_v59 = vadd.f32 %v1310_v49, %v1309_v40  ;;  %v902_v14 = vmax.f32 %v872_v4, 0.0  ;;  %v892_v40 = vmax.f32 %v822_v35, 0.0  ;;  %v910_v49 = vld [vmem:[%s2055_s5 + $0x20] sm:$0xff] }
 0x226   :  { %v1312_v1 = vpop.f32.mrf.mxu1 }
 0x227   :  { %v877_v60 = vadd.f32 %v1311_v59, %v733_v46  ;;  %v890_v46 = vmax.f32 %v812_v44, 0.0 }
 0x228   :  { %v1313_v51 = vpop.f32.mrf.mxu1 }
 0x229   :  { %v1314_v3 = vadd.f32 %v1313_v51, %v1312_v1  ;;  %v903_v9 = vmax.f32 %v877_v60, 0.0  ;;  %v912_v1 = vld [vmem:[%s2055_s5 + $0x30] sm:$0xff]  ;;  %v913_v51 = vld [vmem:[%s2055_s5 + $0x38] sm:$0xff] }
 0x22a   :  { %v1315_v54 = vpop.f32.mrf.mxu1 }
 0x22b   :  { %v882_v61 = vadd.f32 %v1314_v3, %v738_v39  ;;  %v893_v39 = vmax.f32 %v827_v25, 0.0 }
 0x22c   :  { %v1316_v63 = vpop.f32.mrf.mxu1 }
 0x22d   :  { %v1317_v6 = vadd.f32 %v1316_v63, %v1315_v54  ;;  %v904_v5 = vmax.f32 %v882_v61, 0.0  ;;  %v930_v54 = vpop.permute.xlu1 %929 }
 0x22f   :  { %v887_v43 = vadd.f32 %v1317_v6, %v743_v37  ;;  %v673_v37 = vpop.permute.xlu0 %672 }
 0x230   :  { %v817_v38 = vadd.f32 %v2007_v19, %v673_v37  ;;  %v908_v19 = vld [vmem:[%s2055_s5 + $0x10] sm:$0xff]  ;;  %s1469_s5 = smov [#allocation3]  }
 0x231   :  { %v905_v2 = vmax.f32 %v887_v43, 0.0  ;;  %v940_v56 = vpop.permute.xlu1 %939  ;;  %s1162_s16 = sshll.u32 %s1469_s5, 4  ;;  %s1163_s16 = int_to_ptr.vmem [resolvable:$true] %s1162_s16 }
 0x232   :  { %v891_v13 = vmax.f32 %v817_v38, 0.0  ;;  %s1446_s17 = scalar_lea.vmem %s1163_s16, 16  ;;  %s1450_s18 = scalar_lea.vmem %s1163_s16, 32 }
 0x233   :  { %1398 = vmatprep.subr.mxu0 %v905_v2  ;;  %v925_v62 = vpop.permute.xlu0 %924  ;;  %p1447_p0 = scmp.ne.s32.totalorder %s1163_s16, %s1446_s17  ;;  %p1451_p1 = scmp.lt.s32.totalorder %s1163_s16, %s1163_s16 }
 0x234   :  { %1399 = vmatpush3.msra.mxu0 %v905_v2  ;;  %p1452_p2 = scmp.lt.s32.totalorder %s1450_s18, %s1446_s17 }
 0x235   :  { %1400 = vmatprep.subr.mxu0 %v904_v5  ;;  %v1091_v59 = vpop.permute.xlu1 %1090 }
 0x236   :  { %1401 = vmatpush3.msra.mxu0 %v904_v5  ;;  %p1453_p3 = por %p1452_p2, %p1451_p1 }
 0x237   :  { %1402 = vmatprep.subr.mxu0 %v903_v9  ;;  %v935_v3 = vpop.permute.xlu0 %934 }
 0x238   :  { %1403 = vmatpush3.msra.mxu0 %v903_v9  ;;  %p1454_p4 = pnand %p1453_p3, %p1447_p0 }
 0x239   :  { %1404 = vmatprep.subr.mxu0 %v902_v14  ;;  %v1096_v58 = vpop.permute.xlu1 %1095 }
 0x23a   :  { %1405 = vmatpush3.msra.mxu0 %v902_v14 }
 0x23b   :  { %1406 = vmatprep.subr.mxu0 %v901_v18  ;;  %v1086_v63 = vpop.permute.xlu0 %1085 }
 0x23c   :  { %1407 = vmatpush3.msra.mxu0 %v901_v18 }
 0x23d   :  { %1408 = vmatprep.subr.mxu0 %v900_v21  ;;  %v1101_v42 = vpop.permute.xlu1 %1100 }
 0x23e   :  { %1409 = vmatpush3.msra.mxu0 %v900_v21 }
 0x23f   :  { %1410 = vmatprep.subr.mxu0 %v899_v45  ;;  %v945_v6 = vpop.permute.xlu0 %944 }
 0x240   :  { %1411 = vmatpush3.msra.mxu0 %v899_v45 }
 0x241   :  { %1412 = vmatprep.subr.mxu0 %v898_v28  ;;  %v1106_v12 = vpop.permute.xlu1 %1105 }
 0x242   :  { %1413 = vmatpush3.msra.mxu0 %v898_v28 }
 0x243   :  { %1414 = vmatprep.subr.mxu0 %v897_v32  ;;  %v950_v61 = vpop.permute.xlu0 %949 }
 0x244   :  { %1415 = vmatpush3.msra.mxu0 %v897_v32 }
 0x245   :  { %1416 = vmatprep.subr.mxu0 %v896_v33  ;;  %v1111_v29 = vpop.permute.xlu1 %1110 }
 0x246   :  { %1417 = vmatpush3.msra.mxu0 %v896_v33 }
 0x247   :  { %1418 = vmatprep.subr.mxu0 %v895_v26  ;;  %v955_v7 = vpop.permute.xlu0 %954 }
 0x248   :  { %1419 = vmatpush3.msra.mxu0 %v895_v26 }
 0x249   :  { %1420 = vmatprep.subr.mxu0 %v894_v36 }
 0x24a   :  { %1421 = vmatpush3.msra.mxu0 %v894_v36 }
 0x24b   :  { %1422 = vmatprep.subr.mxu0 %v893_v39  ;;  %v960_v22 = vpop.permute.xlu0 %959 }
 0x24c   :  { %1423 = vmatpush3.msra.mxu0 %v893_v39  ;;  %v1121_v39 = vpop.permute.xlu1 %1120 }
 0x24d   :  { %1424 = vmatprep.subr.mxu0 %v892_v40 }
 0x24e   :  { %1425 = vmatpush3.msra.mxu0 %v892_v40  ;;  %v1150_v40 = vlaneseq }
 0x24f   :  { %1426 = vmatprep.subr.mxu0 %v891_v13  ;;  %v1116_v36 = vpop.permute.xlu0 %1115 }
 0x250   :  { %1427 = vmatpush3.msra.mxu0 %v891_v13 }
 0x251   :  { %1428 = vmatprep.subr.mxu0 %v890_v46 }
 0x252   :  { %1429 = vmatpush3.msra.mxu0 %v890_v46 }
 0x253   :  { %1431 = vmatmul.mubr.f32.vlgmr.msra.gmra.mxu0 %v907_v48  ;;  %v1151_v48 = vshrl.u32 %v1150_v40, 7 }
 0x254   :  { %1433 = vmatprep.mubr.f32.mxu0 %v908_v19 }
 0x257   :  { %1434 = vmatmul.mubr.f32.gmra.mxu0 %v909_v17 }
 0x258   :  { %1436 = vmatprep.mubr.f32.mxu0 %v910_v49  ;;  %v1152_v49 = vsub.s32 0, %v1151_v48 }
 0x25b   :  { %1437 = vmatmul.mubr.f32.gmra.mxu0 %v911_v41 }
 0x25c   :  { %1439 = vmatprep.mubr.f32.mxu0 %v912_v1  ;;  %v1148_v1 = vpop.permute.xlu0 %1147 }
 0x25f   :  { %1440 = vmatmul.mubr.f32.gmra.mxu0 %v913_v51 }
 0x313   :  { %v1432_v43 = vpop.f32.mrf.mxu0 }
 0x314   :  { %v1034_v0 = vadd.f32 %v1432_v43, %v930_v54 }
 0x315   :  { %v1028_v60 = vpop.f32.mrf.mxu0 }
 0x316   :  { %v1029_v2 = vadd.f32 %v1028_v60, %v925_v62  ;;  %v1068_v55 = vmax.f32 %v1034_v0, 0.0  ;;  %v1153_v62 = vrot.slane %v1148_v1, %v1152_v49 }
 0x317   :  { %v1435_v47 = vpop.f32.mrf.mxu0 }
 0x318   :  { %v1067_v4 = vmax.f32 %v1029_v2, 0.0  ;;  %v1044_v5 = vadd.f32 %v1435_v47, %v940_v56  ;;  %v1124_v15 = vmul.f32 %v1091_v59, %v1068_v55 }
 0x319   :  { %v1038_v57 = vpop.f32.mrf.mxu0 }
 0x31a   :  { %v1123_v9 = vmul.f32 %v1086_v63, %v1067_v4  ;;  %v1039_v10 = vadd.f32 %v1038_v57, %v935_v3  ;;  %v1070_v52 = vmax.f32 %v1044_v5, 0.0 }
 0x31b   :  { %v1438_v14 = vpop.f32.mrf.mxu0 }
 0x31c   :  { %v1069_v16 = vmax.f32 %v1039_v10, 0.0  ;;  %v1054_v53 = vadd.f32 %v1438_v14, %v950_v61  ;;  %v1131_v11 = vadd.f32 %v1124_v15, %v1123_v9  ;;  %v1126_v23 = vmul.f32 %v1101_v42, %v1070_v52 }
 0x31d   :  { %v1048_v18 = vpop.f32.mrf.mxu0 }
 0x31e   :  { %v1125_v20 = vmul.f32 %v1096_v58, %v1069_v16  ;;  %v1049_v21 = vadd.f32 %v1048_v18, %v945_v6  ;;  %v1072_v30 = vmax.f32 %v1054_v53, 0.0 }
 0x31f   :  { %v1441_v24 = vpop.f32.mrf.mxu0 }
 0x320   :  { %v1132_v45 = vadd.f32 %v1131_v11, %v1125_v20  ;;  %v1071_v31 = vmax.f32 %v1049_v21, 0.0  ;;  %v1064_v28 = vadd.f32 %v1441_v24, %v960_v22  ;;  %v1128_v34 = vmul.f32 %v1111_v29, %v1072_v30 }
 0x321   :  { %v1058_v32 = vpop.f32.mrf.mxu0 }
 0x322   :  { %v1127_v27 = vmul.f32 %v1106_v12, %v1071_v31  ;;  %v1133_v8 = vadd.f32 %v1132_v45, %v1126_v23  ;;  %v1059_v33 = vadd.f32 %v1058_v32, %v955_v7  ;;  %v1074_v26 = vmax.f32 %v1064_v28, 0.0 }
 0x324   :  { %v1134_v25 = vadd.f32 %v1133_v8, %v1127_v27  ;;  %v1073_v35 = vmax.f32 %v1059_v33, 0.0  ;;  %v1130_v50 = vmul.f32 %v1121_v39, %v1074_v26 }
 0x326   :  { %v1129_v37 = vmul.f32 %v1116_v36, %v1073_v35  ;;  %v1135_v38 = vadd.f32 %v1134_v25, %v1128_v34 }
 0x328   :  { %v1136_v44 = vadd.f32 %v1135_v38, %v1129_v37 }
 0x32a   :  { %v1137_v13 = vadd.f32 %v1136_v44, %v1130_v50 }
 0x32c   :  { %v1138_v46 = vrot.slane %v1137_v13, 4 }
 0x32e   :  { %v1139_v19 = vadd.f32 %v1138_v46, %v1137_v13 }
 0x330   :  { %v1140_v17 = vrot.slane %v1139_v19, 2 }
 0x332   :  { %v1141_v41 = vadd.f32 %v1140_v17, %v1139_v19 }
 0x334   :  { %v1142_v51 = vrot.slane %v1141_v41, 1 }
 0x336   :  { %v1143_v54 = vadd.f32 %v1142_v51, %v1141_v41 }
 0x338   :  { %v1154_v3 = vadd.f32 %v1153_v62, %v1143_v54 }
 0x33a   :  { %1155 = vst [vmem:[#allocation3] sm:$0x1] %v1154_v3 }
 0x33b   :  { %1457 = shalt.err (!%p1454_p4)
}
 0x33c   :  { %1165 = dma.vmem_to_hbm [thread:$0]  %s1163_s16, 16, %s2059_s9, [#allocation4]  }
 0x33d   :  { %1466 = dma.done.wait [#allocation4], 16  }
 0x33e   :  { %1467 = vsyncadd [#allocation4], 4294967280 }
 0x33f   :  { %1169 = vsyncpa [#allocation4], 1 }

</bundles_post_ra>
